<compile_context>
chip_gen: v5e
topology: v5e:2x2
jax: 0.10.0
libtpu: 0.0.40
codegen_flags: <defaults>
</compile_context>

<pallas_src>
import math
import functools

import jax
import jax.numpy as jnp
from jax.experimental import pallas as pl
from jax.experimental.pallas import tpu as pltpu


LANES = 512            # lane-dense slab width (multiple of 128)
ROW_ALIGN = 32         # sublane alignment valid for f32 / bf16 / int8 blocks
MAX_BLOCK_ROWS = 1024  # 1024 x 512 f32 = 2 MiB per input block
NUM_SPLITS = 2         # leading 'parallel' axis (2 TCs on v7x; no-op elsewhere)


def _round_up(x, m):
    return (x + m - 1) // m * m


def _cdiv(a, b):
    return -(-a // b)


def _balanced_partial(diff, *, alpha, gamma, beta, c_ab, c_bb, c_hi):
    """Elementwise Balanced-L1 on a block, tree-reduced to an (8, LANES) slab."""
    # Strength-reduced: (alpha/b)*(b*d + 1) == alpha*d + alpha/b  (reuse alpha*d)
    ad = alpha * diff
    low = (ad + c_ab) * jnp.log(c_bb * diff + 1.0) - ad
    high = gamma * diff + c_hi
    loss = jnp.where(diff < beta, low, high)
    # Pure VALU vreg adds over the leading axis (no relayout: splits sublane-major dim).
    return loss.reshape(-1, 8, loss.shape[-1]).sum(axis=0)


def _row_mask_diff(diff, i, *, blocks_per_split, block_rows, valid_rows):
    """Zero `diff` on rows beyond the real slab (garbage OOB reads -> 0 loss)."""
    blk = pl.program_id(0) * blocks_per_split + i          # unclamped global block idx
    start = blk * block_rows
    row = jax.lax.broadcasted_iota(jnp.int32, diff.shape, 0)
    return jnp.where(start + row < valid_rows, diff, 0.0)


def _bl1_kernel_nomask(pred_ref, gt_ref, lsum_ref, acc_ref, *,
                       alpha, gamma, beta, c_ab, c_bb, c_hi,
                       block_rows, blocks_per_split, valid_rows, need_row_mask):
    i = pl.program_id(1)

    p = pred_ref[...].astype(jnp.float32)
    g = gt_ref[...].astype(jnp.float32)
    diff = jnp.abs(p - g)
    if need_row_mask:
        diff = _row_mask_diff(diff, i, blocks_per_split=blocks_per_split,
                              block_rows=block_rows, valid_rows=valid_rows)
    partial = _balanced_partial(diff, alpha=alpha, gamma=gamma, beta=beta,
                                c_ab=c_ab, c_bb=c_bb, c_hi=c_hi)

    @pl.when(i == 0)
    def _():
        acc_ref[...] = partial

    @pl.when(i > 0)
    def _():
        acc_ref[...] += partial

    @pl.when(i == pl.num_programs(1) - 1)
    def _():
        lsum_ref[0, 0] = jnp.sum(acc_ref[...])


def _bl1_kernel_masked(pred_ref, gt_ref, mask_ref, lsum_ref, acc_ref, *,
                       alpha, gamma, beta, c_ab, c_bb, c_hi,
                       block_rows, blocks_per_split, valid_rows, need_row_mask):
    i = pl.program_id(1)

    p = pred_ref[...].astype(jnp.float32)
    g = gt_ref[...].astype(jnp.float32)
    m = mask_ref[...].astype(jnp.float32)
    # abs((p - g) * m) == abs(p*m - g*m): identical to masking the inputs.
    diff = jnp.abs((p - g) * m)
    if need_row_mask:
        diff = _row_mask_diff(diff, i, blocks_per_split=blocks_per_split,
                              block_rows=block_rows, valid_rows=valid_rows)
    partial = _balanced_partial(diff, alpha=alpha, gamma=gamma, beta=beta,
                                c_ab=c_ab, c_bb=c_bb, c_hi=c_hi)

    @pl.when(i == 0)
    def _():
        acc_ref[...] = partial

    @pl.when(i > 0)
    def _():
        acc_ref[...] += partial

    @pl.when(i == pl.num_programs(1) - 1)
    def _():
        lsum_ref[0, 0] = jnp.sum(acc_ref[...])


def balanced_l1_loss_pallas(pred, gt, mask=None, *,
                            loss_weight=1.0, beta=1.0, alpha=0.5, gamma=1.5):
    """Equivalent of BalancedL1Loss.forward (reduction='none' + sum/num*weight)."""
    assert beta > 0
    assert pred.shape == gt.shape and pred.ndim == 3 and pred.size > 0
    B, N, C = pred.shape

    b_const = math.e ** (gamma / alpha) - 1.0
    consts = dict(alpha=float(alpha), gamma=float(gamma), beta=float(beta),
                  c_ab=float(alpha / b_const),
                  c_bb=float(b_const / beta),
                  c_hi=float(gamma / b_const - alpha * beta))

    # ---- slab geometry ------------------------------------------------------
    total = B * N * C
    rows_exact = _cdiv(total, LANES)
    if total % LANES == 0 and rows_exact >= ROW_ALIGN:
        rows, pad_elems = rows_exact, 0               # zero-pad-copy fast path
    else:
        rows = max(_round_up(rows_exact, ROW_ALIGN), ROW_ALIGN)
        pad_elems = rows * LANES - total              # tiny / unaligned fallback

    def to_slab(x):
        flat = x.reshape(-1)
        if pad_elems:
            flat = jnp.pad(flat, (0, pad_elems))      # pads with zeros -> 0 loss
        return flat.reshape(rows, LANES)

    block_rows = min(MAX_BLOCK_ROWS, (rows // ROW_ALIGN) * ROW_ALIGN)
    num_blocks = _cdiv(rows, block_rows)
    splits = min(NUM_SPLITS, num_blocks)
    bp = _cdiv(num_blocks, splits)
    # Mask in-kernel whenever the grid covers more rows than the physical slab.
    need_row_mask = (splits * bp * block_rows != rows)

    def idx_map(c, i):
        # Clamp so no block index is ever fully out of range; the kernel's
        # row mask zeroes contributions from such duplicated/overshoot blocks.
        return (jnp.minimum(c * bp + i, num_blocks - 1), 0)

    blk_spec = pl.BlockSpec((block_rows, LANES), idx_map)

    static = dict(block_rows=block_rows, blocks_per_split=bp,
                  valid_rows=rows, need_row_mask=need_row_mask, **consts)

    # Native dtype in; cast to f32 inside the kernel (halves HBM for bf16).
    args = [to_slab(pred), to_slab(gt)]
    in_specs = [blk_spec, blk_spec]

    if mask is None:
        kernel = functools.partial(_bl1_kernel_nomask, **static)
    else:
        assert mask.shape == (B, N)
        # Compact mask stream: int8 for bool/int masks, native float otherwise.
        mdt = mask.dtype if jnp.issubdtype(mask.dtype, jnp.floating) else jnp.int8
        mask_full = jnp.broadcast_to(mask.astype(mdt)[:, :, None], (B, N, C))
        args.append(to_slab(mask_full))
        in_specs.append(blk_spec)
        kernel = functools.partial(_bl1_kernel_masked, **static)

    partials = pl.pallas_call(
        kernel,
        out_shape=jax.ShapeDtypeStruct((splits, 1), jnp.float32),
        grid_spec=pltpu.PrefetchScalarGridSpec(
            num_scalar_prefetch=0,
            grid=(splits, bp),
            in_specs=in_specs,
            out_specs=pl.BlockSpec((1, 1), lambda c, i: (c, 0),
                                   memory_space=pltpu.SMEM),
            scratch_shapes=[pltpu.VMEM((8, LANES), jnp.float32)],
        ),
        compiler_params=pltpu.CompilerParams(
            dimension_semantics=("parallel", "arbitrary")),
    )(*args)

    loss_sum = jnp.sum(partials)

    # `num` is a row count (B*N or sum(mask)), computed in the wrapper.
    if mask is None:
        num = jnp.float32(B * N)
    else:
        num = jnp.sum(mask.astype(jnp.float32))
    return loss_sum / (num + 0.0001) * jnp.float32(loss_weight)


def _balanced_l1_ref(pred, gt, mask=None, *, loss_weight=1.0,
                     beta=1.0, alpha=0.5, gamma=1.5):
    """Pure-JAX reference mirroring the PyTorch module."""
    num = pred.shape[0] * pred.shape[1]
    if mask is not None:
        num = jnp.sum(mask.astype(jnp.float32))
        m = mask.astype(jnp.float32)[..., None]
        pred = pred * m
        gt = gt * m
    diff = jnp.abs(pred - gt)
    b = math.e ** (gamma / alpha) - 1.0
    loss = jnp.where(
        diff < beta,
        alpha / b * (b * diff + 1) * jnp.log(b * diff / beta + 1) - alpha * diff,
        gamma * diff + gamma / b - alpha * beta)
    return jnp.sum(loss) / (num + 0.0001) * loss_weight


if __name__ == "__main__":
    key = jax.random.PRNGKey(0)

    # Case 1: tiny shape (padded fallback path), masked and unmasked.
    k1, k2, k3, k4, k5, k6 = jax.random.split(key, 6)
    B, N, C = 2, 8, 4
    pred = jax.random.normal(k1, (B, N, C), dtype=jnp.float32) * 2.0
    gt = jax.random.normal(k2, (B, N, C), dtype=jnp.float32) * 2.0
    mask = (jax.random.uniform(k3, (B, N)) > 0.3).astype(jnp.float32)

    out_nomask = jax.block_until_ready(balanced_l1_loss_pallas(pred, gt))
    ref_nomask = _balanced_l1_ref(pred, gt)
    out_mask = jax.block_until_ready(balanced_l1_loss_pallas(pred, gt, mask))
    ref_mask = _balanced_l1_ref(pred, gt, mask)

    assert jnp.allclose(out_nomask, ref_nomask, rtol=1e-5, atol=1e-5), (out_nomask, ref_nomask)
    assert jnp.allclose(out_mask, ref_mask, rtol=1e-5, atol=1e-5), (out_mask, ref_mask)

    # Case 2: LANES-aligned shape -> zero-copy path, 2 splits, partial last
    # block exercised via the in-kernel row mask (rows=36, block_rows=32).
    B2, N2, C2 = 2, 2304, 4
    pred2 = jax.random.normal(k4, (B2, N2, C2), dtype=jnp.float32) * 2.0
    gt2 = jax.random.normal(k5, (B2, N2, C2), dtype=jnp.float32) * 2.0
    mask2 = (jax.random.uniform(k6, (B2, N2)) > 0.3).astype(jnp.float32)

    out2_nomask = jax.block_until_ready(balanced_l1_loss_pallas(pred2, gt2))
    ref2_nomask = _balanced_l1_ref(pred2, gt2)
    out2_mask = jax.block_until_ready(balanced_l1_loss_pallas(pred2, gt2, mask2))
    ref2_mask = _balanced_l1_ref(pred2, gt2, mask2)

    assert jnp.allclose(out2_nomask, ref2_nomask, rtol=1e-4, atol=1e-4), (out2_nomask, ref2_nomask)
    assert jnp.allclose(out2_mask, ref2_mask, rtol=1e-4, atol=1e-4), (out2_mask, ref2_mask)

    print("KERNEL_OK")
</pallas_src>

<mosaic_0001>
module attributes {stable_mosaic.version = 11 : i64} {
  func.func @_bl1_kernel_nomask(%arg0: i32, %arg1: i32, %arg2: memref<32x512xf32, #tpu.memory_space<vmem>>, %arg3: memref<32x512xf32, #tpu.memory_space<vmem>>, %arg4: memref<1x1xf32, #tpu.memory_space<smem>>, %arg5: memref<8x512xf32, #tpu.memory_space<vmem>>) attributes {dimension_semantics = [#tpu.dimension_semantics<parallel>, #tpu.dimension_semantics<arbitrary>], iteration_bounds = array<i64: 1, 1>, scalar_prefetch = 0 : i64, scratch_operands = 1 : i64, tpu.core_type = #tpu.core_type<tc>, window_params = [{transform_indices = @transform_0, window_bounds = array<i64: 32, 512>}, {transform_indices = @transform_1, window_bounds = array<i64: 32, 512>}, {transform_indices = @transform_2, window_bounds = array<i64: 1, 1>}]} {
    %c0 = arith.constant 0 : index
    %c0_0 = arith.constant 0 : index
    %0 = vector.load %arg2[%c0, %c0_0] : memref<32x512xf32, #tpu.memory_space<vmem>>, vector<32x512xf32>
    %c0_1 = arith.constant 0 : index
    %c0_2 = arith.constant 0 : index
    %1 = vector.load %arg3[%c0_1, %c0_2] : memref<32x512xf32, #tpu.memory_space<vmem>>, vector<32x512xf32>
    %2 = arith.subf %0, %1 : vector<32x512xf32>
    %3 = math.absf %2 : vector<32x512xf32>
    %cst = arith.constant 5.000000e-01 : f32
    %4 = vector.broadcast %cst : f32 to vector<32x512xf32>
    %5 = arith.mulf %4, %3 : vector<32x512xf32>
    %cst_3 = arith.constant 0.0261978488 : f32
    %6 = vector.broadcast %cst_3 : f32 to vector<32x512xf32>
    %7 = arith.addf %5, %6 : vector<32x512xf32>
    %cst_4 = arith.constant 19.085537 : f32
    %8 = vector.broadcast %cst_4 : f32 to vector<32x512xf32>
    %9 = arith.mulf %8, %3 : vector<32x512xf32>
    %cst_5 = arith.constant 1.000000e+00 : f32
    %10 = vector.broadcast %cst_5 : f32 to vector<32x512xf32>
    %11 = arith.addf %9, %10 : vector<32x512xf32>
    %12 = math.log %11 : vector<32x512xf32>
    %13 = arith.mulf %7, %12 : vector<32x512xf32>
    %14 = arith.subf %13, %5 : vector<32x512xf32>
    %cst_6 = arith.constant 1.500000e+00 : f32
    %15 = vector.broadcast %cst_6 : f32 to vector<32x512xf32>
    %16 = arith.mulf %15, %3 : vector<32x512xf32>
    %cst_7 = arith.constant -0.421406448 : f32
    %17 = vector.broadcast %cst_7 : f32 to vector<32x512xf32>
    %18 = arith.addf %16, %17 : vector<32x512xf32>
    %cst_8 = arith.constant 1.000000e+00 : f32
    %19 = vector.broadcast %cst_8 : f32 to vector<32x512xf32>
    %20 = arith.cmpf olt, %3, %19 : vector<32x512xf32>
    %21 = arith.select %20, %14, %18 : vector<32x512xi1>, vector<32x512xf32>
    %22 = vector.shape_cast %21 : vector<32x512xf32> to vector<4x8x512xf32>
    %cst_9 = arith.constant dense<0.000000e+00> : vector<8x512xf32>
    %23 = vector.multi_reduction <add>, %22, %cst_9 [0] : vector<4x8x512xf32> to vector<8x512xf32>
    %c0_i32 = arith.constant 0 : i32
    %24 = arith.cmpi eq, %arg1, %c0_i32 : i32
    %25 = arith.extui %24 : i1 to i32
    %c0_i32_10 = arith.constant 0 : i32
    %26 = arith.cmpi ne, %25, %c0_i32_10 : i32
    scf.if %26 {
      %c0_15 = arith.constant 0 : index
      %c0_16 = arith.constant 0 : index
      %33 = vector.load %arg5[%c0_15, %c0_16] : memref<8x512xf32, #tpu.memory_space<vmem>>, vector<8x512xf32>
      tpu.vector_store %arg5[%c0_15, %c0_16], %23 {strides = array<i32>} : memref<8x512xf32, #tpu.memory_space<vmem>>, vector<8x512xf32>,
    } else {
    }
    %c0_i32_11 = arith.constant 0 : i32
    %27 = arith.cmpi sgt, %arg1, %c0_i32_11 : i32
    %28 = arith.extui %27 : i1 to i32
    %c0_i32_12 = arith.constant 0 : i32
    %29 = arith.cmpi ne, %28, %c0_i32_12 : i32
    scf.if %29 {
      %c0_15 = arith.constant 0 : index
      %c0_16 = arith.constant 0 : index
      %33 = vector.load %arg5[%c0_15, %c0_16] : memref<8x512xf32, #tpu.memory_space<vmem>>, vector<8x512xf32>
      %34 = arith.addf %33, %23 : vector<8x512xf32>
      %c0_17 = arith.constant 0 : index
      %c0_18 = arith.constant 0 : index
      %35 = vector.load %arg5[%c0_17, %c0_18] : memref<8x512xf32, #tpu.memory_space<vmem>>, vector<8x512xf32>
      tpu.vector_store %arg5[%c0_17, %c0_18], %34 {strides = array<i32>} : memref<8x512xf32, #tpu.memory_space<vmem>>, vector<8x512xf32>,
    } else {
    }
    %c0_i32_13 = arith.constant 0 : i32
    %30 = arith.cmpi eq, %arg1, %c0_i32_13 : i32
    %31 = arith.extui %30 : i1 to i32
    %c0_i32_14 = arith.constant 0 : i32
    %32 = arith.cmpi ne, %31, %c0_i32_14 : i32
    scf.if %32 {
      %c0_15 = arith.constant 0 : index
      %c0_16 = arith.constant 0 : index
      %33 = vector.load %arg5[%c0_15, %c0_16] : memref<8x512xf32, #tpu.memory_space<vmem>>, vector<8x512xf32>
      %34 = vector.shape_cast %33 : vector<8x512xf32> to vector<1x8x512xf32>
      %cst_17 = arith.constant dense<0.000000e+00> : vector<1xf32>
      %35 = vector.multi_reduction <add>, %34, %cst_17 [1, 2] : vector<1x8x512xf32> to vector<1xf32>
      %36 = vector.shape_cast %35 : vector<1xf32> to vector<1x1x1xf32>
      %37 = vector.extract %36[0, 0, 0] : f32 from vector<1x1x1xf32>
      %c0_18 = arith.constant 0 : index
      %c0_19 = arith.constant 0 : index
      %38 = memref.load %arg4[%c0_18, %c0_19] : memref<1x1xf32, #tpu.memory_space<smem>>
      memref.store %37, %arg4[%c0_18, %c0_19] : memref<1x1xf32, #tpu.memory_space<smem>>
    } else {
    }
    return
  }
  func.func @transform_0(%arg0: i32, %arg1: i32) -> (i32, i32) {
    %c1_i32 = arith.constant 1 : i32
    %0 = arith.muli %arg0, %c1_i32 : i32
    %1 = arith.addi %0, %arg1 : i32
    %c0_i32 = arith.constant 0 : i32
    %2 = arith.minsi %1, %c0_i32 : i32
    %c0_i32_0 = arith.constant 0 : i32
    %c0_i32_1 = arith.constant 0 : i32
    return %2, %c0_i32_0 : i32, i32
  }
  func.func @transform_1(%arg0: i32, %arg1: i32) -> (i32, i32) {
    %c1_i32 = arith.constant 1 : i32
    %0 = arith.muli %arg0, %c1_i32 : i32
    %1 = arith.addi %0, %arg1 : i32
    %c0_i32 = arith.constant 0 : i32
    %2 = arith.minsi %1, %c0_i32 : i32
    %c0_i32_0 = arith.constant 0 : i32
    %c0_i32_1 = arith.constant 0 : i32
    return %2, %c0_i32_0 : i32, i32
  }
  func.func @transform_2(%arg0: i32, %arg1: i32) -> (i32, i32) {
    %c0_i32 = arith.constant 0 : i32
    %c0_i32_0 = arith.constant 0 : i32
    return %arg0, %c0_i32 : i32, i32
  }
}

</mosaic_0001>

<bundles_post_ra>
// kernel: tpu_custom_call.1
= control target key start
LH: loop header
LB: loop body
LE: loop exit
PB: predicated region body
PF: predicated region fallthrough
CT: control target
= control target key end

     0   :  { %7 = vsyncpa [#allocation4], 0  ;;  %s829_s0 = inlined_call_operand.hbm [shape: f32[32,512], index: 0, kind: input, shape index: {}]   ;;  %s830_s1 = inlined_call_operand.hbm [shape: f32[32,512], index: 1, kind: input, shape index: {}]   ;;  %s831_s2 = inlined_call_operand.hbm [shape: f32[1,1], index: 2, kind: output, shape index: {}]  }
   0x1   :  { %8 = vsyncpa [#allocation7], 0 }
   0x2   :  { %9 = vsyncpa [#allocation5], 0  ;;  %s21_s11 = sshll.u32 %s829_s0, 4  ;;  %s505_s12 = smov [#allocation3]   ;;  %s22_s11 = int_to_ptr.hbm [resolvable:$true] %s21_s11 }
   0x3   :  { %s23_s13 = sshll.u32 %s505_s12, 4  ;;  %s41_s16 = sshll.u32 %s830_s1, 4  ;;  %s24_s13 = int_to_ptr.vmem [resolvable:$true] %s23_s13  ;;  %s42_s16 = int_to_ptr.hbm [resolvable:$true] %s41_s16 }
   0x4   :  { %s506_s17 = smov 512   ;;  %s507_s18 = smov 32  }
   0x5   :  { %29 = dma.hbm_to_vmem [thread:$0]  %s22_s11, 2048, %s24_s13, [#allocation4], %s506_s17, %s506_s17, %s507_s18  }
   0x6   :  { %s508_s19 = smov [#allocation6]  }
   0x7   :  { %s43_s20 = sshll.u32 %s508_s19, 4  ;;  %s44_s20 = int_to_ptr.vmem [resolvable:$true] %s43_s20 }
   0x8   :  { %49 = dma.hbm_to_vmem [thread:$0]  %s42_s16, 2048, %s44_s20, [#allocation7], %s506_s17, %s506_s17, %s507_s18  }
   0x9   :  { %499 = dma.done.wait [#allocation4], 2048  }
   0xa   :  { %500 = vsyncadd [#allocation4], 4294965248 }
   0xb   :  { %501 = dma.done.wait [#allocation7], 2048  }
   0xc   :  { %502 = vsyncadd [#allocation7], 4294965248  ;;  %v66_v0 = vld [vmem:[#allocation3] sm:$0xff]  ;;  %v67_v1 = vld [vmem:[#allocation3 + $0x8] sm:$0xff]  ;;  %s384_s21 = sshll.u32 %s831_s2, 4  ;;  %s509_s23 = smov [#allocation8]   ;;  %s385_s21 = int_to_ptr.hbm [resolvable:$true] %s384_s21 }
   0xd   :  { %v68_v2 = vld [vmem:[#allocation3 + $0x10] sm:$0xff]  ;;  %v69_v3 = vld [vmem:[#allocation3 + $0x18] sm:$0xff]  ;;  %v70_v4 = vld [vmem:[#allocation3 + $0x20] sm:$0xff] }
   0xe   :  { %v71_v5 = vld [vmem:[#allocation3 + $0x28] sm:$0xff]  ;;  %v72_v6 = vld [vmem:[#allocation3 + $0x30] sm:$0xff]  ;;  %v73_v7 = vld [vmem:[#allocation3 + $0x38] sm:$0xff] }
   0xf   :  { %v74_v8 = vld [vmem:[#allocation3 + $0x40] sm:$0xff]  ;;  %v75_v9 = vld [vmem:[#allocation3 + $0x48] sm:$0xff]  ;;  %v76_v10 = vld [vmem:[#allocation3 + $0x50] sm:$0xff] }
  0x10   :  { %v82_v11 = vld [vmem:[#allocation6] sm:$0xff]  ;;  %v83_v12 = vld [vmem:[#allocation6 + $0x8] sm:$0xff]  ;;  %v77_v13 = vld [vmem:[#allocation3 + $0x58] sm:$0xff] }
  0x11   :  { %v78_v14 = vld [vmem:[#allocation3 + $0x60] sm:$0xff]  ;;  %v79_v15 = vld [vmem:[#allocation3 + $0x68] sm:$0xff]  ;;  %v84_v16 = vld [vmem:[#allocation6 + $0x10] sm:$0xff]  ;;  %v98_v19 = vsub.f32 %v66_v0, %v82_v11  ;;  %v99_v20 = vsub.f32 %v67_v1, %v83_v12 }
  0x12   :  { %v85_v17 = vld [vmem:[#allocation6 + $0x18] sm:$0xff]  ;;  %v86_v18 = vld [vmem:[#allocation6 + $0x20] sm:$0xff]  ;;  %v80_v21 = vld [vmem:[#allocation3 + $0x70] sm:$0xff]  ;;  %v100_v26 = vsub.f32 %v68_v2, %v84_v16 }
  0x13   :  { %v81_v22 = vld [vmem:[#allocation3 + $0x78] sm:$0xff]  ;;  %v87_v23 = vld [vmem:[#allocation6 + $0x28] sm:$0xff]  ;;  %v88_v24 = vld [vmem:[#allocation6 + $0x30] sm:$0xff]  ;;  %v101_v30 = vsub.f32 %v69_v3, %v85_v17  ;;  %v102_v31 = vsub.f32 %v70_v4, %v86_v18  ;;  %v531_v38 = vand.u32 2147483647, %v98_v19 }
  0x14   :  { %v89_v25 = vld [vmem:[#allocation6 + $0x38] sm:$0xff]  ;;  %v90_v27 = vld [vmem:[#allocation6 + $0x40] sm:$0xff]  ;;  %v91_v28 = vld [vmem:[#allocation6 + $0x48] sm:$0xff]  ;;  %v103_v35 = vsub.f32 %v71_v5, %v87_v23  ;;  %v104_v36 = vsub.f32 %v72_v6, %v88_v24  ;;  %v533_v44 = vand.u32 2147483647, %v99_v20 }
  0x15   :  { %v92_v29 = vld [vmem:[#allocation6 + $0x50] sm:$0xff]  ;;  %v93_v32 = vld [vmem:[#allocation6 + $0x58] sm:$0xff]  ;;  %v94_v33 = vld [vmem:[#allocation6 + $0x60] sm:$0xff]  ;;  %v105_v37 = vsub.f32 %v73_v7, %v89_v25  ;;  %v106_v41 = vsub.f32 %v74_v8, %v90_v27  ;;  %v107_v42 = vsub.f32 %v75_v9, %v91_v28  ;;  %v535_v48 = vand.u32 2147483647, %v100_v26 }
  0x16   :  { %v95_v34 = vld [vmem:[#allocation6 + $0x68] sm:$0xff]  ;;  %v96_v39 = vld [vmem:[#allocation6 + $0x70] sm:$0xff]  ;;  %v97_v40 = vld [vmem:[#allocation6 + $0x78] sm:$0xff]  ;;  %v108_v43 = vsub.f32 %v76_v10, %v92_v29  ;;  %v109_v45 = vsub.f32 %v77_v13, %v93_v32  ;;  %v110_v46 = vsub.f32 %v78_v14, %v94_v33  ;;  %v537_v51 = vand.u32 2147483647, %v101_v30 }
  0x17   :  { %v111_v47 = vsub.f32 %v79_v15, %v95_v34  ;;  %v112_v49 = vsub.f32 %v80_v21, %v96_v39  ;;  %v113_v50 = vsub.f32 %v81_v22, %v97_v40  ;;  %v539_v52 = vand.u32 2147483647, %v102_v31 }
  0x18   :  { %v541_v53 = vand.u32 2147483647, %v103_v35  ;;  %v543_v54 = vand.u32 2147483647, %v104_v36  ;;  %v545_v55 = vand.u32 2147483647, %v105_v37 }
  0x19   :  { %v547_v56 = vand.u32 2147483647, %v106_v41  ;;  %v549_v57 = vand.u32 2147483647, %v107_v42  ;;  %v551_v58 = vand.u32 2147483647, %v108_v43 }
  0x1a   :  { %v553_v59 = vand.u32 2147483647, %v109_v45  ;;  %v555_v60 = vand.u32 2147483647, %v110_v46  ;;  %v557_v61 = vand.u32 2147483647, %v111_v47 }
  0x1b   :  { %851 = vst [vmem:[#allocation12_spill] sm:$0xff] %v551_v58  ;;  %v559_v62 = vand.u32 2147483647, %v112_v49  ;;  %v561_v63 = vand.u32 2147483647, %v113_v50  ;;  %v564_v0 = vmul.f32 0.5, %v531_v38 }
  0x1c   :  { %852 = vst [vmem:[#allocation13_spill] sm:$0xff] %v553_v59  ;;  %v567_v1 = vmul.f32 0.5, %v533_v44  ;;  %v570_v2 = vmul.f32 0.5, %v535_v48  ;;  %v573_v3 = vmul.f32 0.5, %v537_v51  ;;  %v576_v4 = vmul.f32 0.5, %v539_v52 }
  0x1d   :  { %853 = vst [vmem:[#allocation14_spill] sm:$0xff] %v555_v60  ;;  %v579_v5 = vmul.f32 0.5, %v541_v53  ;;  %v582_v6 = vmul.f32 0.5, %v543_v54  ;;  %v585_v7 = vmul.f32 0.5, %v545_v55  ;;  %v588_v8 = vmul.f32 0.5, %v547_v56 }
  0x1e   :  { %854 = vst [vmem:[#allocation15_spill] sm:$0xff] %v557_v61  ;;  %v591_v9 = vmul.f32 0.5, %v549_v57  ;;  %v594_v10 = vmul.f32 0.5, %v551_v58  ;;  %v597_v11 = vmul.f32 0.5, %v553_v59  ;;  %v600_v12 = vmul.f32 0.5, %v555_v60 }
  0x1f   :  { %855 = vst [vmem:[#allocation16_spill] sm:$0xff] %v559_v62  ;;  %v603_v13 = vmul.f32 0.5, %v557_v61  ;;  %v606_v14 = vmul.f32 0.5, %v559_v62  ;;  %v609_v15 = vmul.f32 0.5, %v561_v63  ;;  %v612_v16 = vadd.f32 0.026197849, %v564_v0 }
  0x20   :  { %856 = vst [vmem:[#allocation17_spill] sm:$0xff] %v561_v63  ;;  %v615_v17 = vadd.f32 0.026197849, %v567_v1  ;;  %v618_v18 = vadd.f32 0.026197849, %v570_v2  ;;  %vm290_vm0 = vcmp.lt.f32.partialorder %v531_v38, 1.0 }
  0x21   :  { %857 = vst [vmem:[#allocation18_spill] sm:$0xff] %v582_v6  ;;  %v621_v19 = vadd.f32 0.026197849, %v573_v3  ;;  %v624_v20 = vadd.f32 0.026197849, %v576_v4  ;;  %vm291_vm1 = vcmp.lt.f32.partialorder %v533_v44, 1.0 }
  0x22   :  { %858 = vst [vmem:[#allocation19_spill] sm:$0xff] %v585_v7  ;;  %v627_v21 = vadd.f32 0.026197849, %v579_v5  ;;  %v630_v22 = vadd.f32 0.026197849, %v582_v6  ;;  %vm292_vm2 = vcmp.lt.f32.partialorder %v535_v48, 1.0 }
  0x23   :  { %859 = vst [vmem:[#allocation20_spill] sm:$0xff] %v588_v8  ;;  %v633_v23 = vadd.f32 0.026197849, %v585_v7  ;;  %v636_v24 = vadd.f32 0.026197849, %v588_v8  ;;  %vm293_vm3 = vcmp.lt.f32.partialorder %v537_v51, 1.0 }
  0x24   :  { %860 = vst [vmem:[#allocation21_spill] sm:$0xff] %v591_v9  ;;  %v639_v25 = vadd.f32 0.026197849, %v591_v9  ;;  %v642_v26 = vadd.f32 0.026197849, %v594_v10  ;;  %vm294_vm4 = vcmp.lt.f32.partialorder %v539_v52, 1.0 }
  0x25   :  { %861 = vst [vmem:[#allocation22_spill] sm:$0xff] %v594_v10  ;;  %v645_v27 = vadd.f32 0.026197849, %v597_v11  ;;  %v648_v28 = vadd.f32 0.026197849, %v600_v12  ;;  %vm295_vm5 = vcmp.lt.f32.partialorder %v541_v53, 1.0 }
  0x26   :  { %862 = vst [vmem:[#allocation23_spill] sm:$0xff] %v597_v11  ;;  %v651_v29 = vadd.f32 0.026197849, %v603_v13  ;;  %v654_v30 = vadd.f32 0.026197849, %v606_v14  ;;  %vm296_vm6 = vcmp.lt.f32.partialorder %v543_v54, 1.0 }
  0x27   :  { %863 = vst [vmem:[#allocation24_spill] sm:$0xff] %v600_v12  ;;  %v657_v31 = vadd.f32 0.026197849, %v609_v15  ;;  %v162_v32 = vmul.f32 19.085537, %v531_v38  ;;  %vm297_vm7 = vcmp.lt.f32.partialorder %v545_v55, 1.0 }
  0x28   :  { %864 = vst [vmem:[#allocation25_spill] sm:$0xff] %v603_v13  ;;  %v163_v33 = vmul.f32 19.085537, %v533_v44  ;;  %v164_v34 = vmul.f32 19.085537, %v535_v48  ;;  %vm298_vm8 = vcmp.lt.f32.partialorder %v547_v56, 1.0 }
  0x29   :  { %865 = vst [vmem:[#allocation26_spill] sm:$0xff] %v606_v14  ;;  %v165_v35 = vmul.f32 19.085537, %v537_v51  ;;  %v166_v36 = vmul.f32 19.085537, %v539_v52  ;;  %v178_v50 = vadd.f32 1.0, %v162_v32 }
  0x2a   :  { %866 = vst [vmem:[#allocation27_spill] sm:$0xff] %v609_v15  ;;  %v167_v37 = vmul.f32 19.085537, %v541_v53  ;;  %v168_v39 = vmul.f32 19.085537, %v543_v54  ;;  %v179_v14 = vadd.f32 1.0, %v163_v33 }
  0x2b   :  { %867 = vst [vmem:[#allocation28_spill] sm:$0xff] %v642_v26  ;;  %v169_v40 = vmul.f32 19.085537, %v545_v55  ;;  %v170_v41 = vmul.f32 19.085537, %v547_v56  ;;  %v180_v13 = vadd.f32 1.0, %v164_v34  ;;  %407 = vlog2.f32 %v178_v50 }
  0x2c   :  { %868 = vst [vmem:[#allocation29_spill] sm:$0xff] %v645_v27  ;;  %v171_v42 = vmul.f32 19.085537, %v549_v57  ;;  %v172_v43 = vmul.f32 19.085537, %v551_v58  ;;  %v181_v12 = vadd.f32 1.0, %v165_v35  ;;  %409 = vlog2.f32 %v179_v14 }
  0x2d   :  { %869 = vst [vmem:[#allocation30_spill] sm:$0xff] %v648_v28  ;;  %v173_v45 = vmul.f32 19.085537, %v553_v59  ;;  %v174_v46 = vmul.f32 19.085537, %v555_v60  ;;  %v183_v11 = vadd.f32 1.0, %v167_v37  ;;  %411 = vlog2.f32 %v180_v13 }
  0x2e   :  { %870 = vst [vmem:[#allocation31_spill] sm:$0xff] %v651_v29  ;;  %v175_v47 = vmul.f32 19.085537, %v557_v61  ;;  %v176_v49 = vmul.f32 19.085537, %v559_v62  ;;  %v184_v10 = vadd.f32 1.0, %v168_v39  ;;  %413 = vlog2.f32 %v181_v12 }
  0x2f   :  { %871 = vst [vmem:[#allocation32_spill] sm:$0xff] %v654_v30  ;;  %v177_v15 = vmul.f32 19.085537, %v561_v63  ;;  %v185_v30 = vadd.f32 1.0, %v169_v40  ;;  %v186_v9 = vadd.f32 1.0, %v170_v41  ;;  %v187_v29 = vadd.f32 1.0, %v171_v42 }
  0x30   :  { %872 = vst [vmem:[#allocation33_spill] sm:$0xff] %v657_v31  ;;  %v182_v31 = vadd.f32 1.0, %v166_v36  ;;  %v188_v8 = vadd.f32 1.0, %v172_v43  ;;  %v189_v28 = vadd.f32 1.0, %v173_v45  ;;  %v190_v7 = vadd.f32 1.0, %v174_v46 }
  0x31   :  { %v191_v27 = vadd.f32 1.0, %v175_v47  ;;  %v675_v6 = vadd.f32 1.0, %v176_v49  ;;  %v677_v26 = vadd.f32 1.0, %v177_v15  ;;  %v258_v32 = vmul.f32 1.5, %v531_v38  ;;  %v408_v43 = vpop.eup %407  ;;  %v893_v38 = vld [vmem:[#allocation16_spill] sm:$0xff] }
  0x32   :  { %v259_v33 = vmul.f32 1.5, %v533_v44  ;;  %v260_v34 = vmul.f32 1.5, %v535_v48  ;;  %v261_v35 = vmul.f32 1.5, %v537_v51  ;;  %v262_v36 = vmul.f32 1.5, %v539_v52  ;;  %v889_v48 = vld [vmem:[#allocation12_spill] sm:$0xff] }
  0x33   :  { %v263_v37 = vmul.f32 1.5, %v541_v53  ;;  %v264_v39 = vmul.f32 1.5, %v543_v54  ;;  %v265_v15 = vmul.f32 1.5, %v545_v55  ;;  %415 = vlog2.f32 %v182_v31 }
  0x34   :  { %v266_v14 = vmul.f32 1.5, %v547_v56  ;;  %v267_v40 = vmul.f32 1.5, %v549_v57  ;;  %v268_v13 = vmul.f32 1.5, %v551_v58  ;;  %417 = vlog2.f32 %v183_v11  ;;  %v410_v11 = vpop.eup %409 }
  0x35   :  { %v691_v41 = vmul.f32 1.5, %v553_v59  ;;  %v694_v42 = vmul.f32 1.5, %v555_v60  ;;  %v697_v12 = vmul.f32 1.5, %v557_v61  ;;  %419 = vlog2.f32 %v184_v10  ;;  %v412_v60 = vpop.eup %411 }
  0x36   :  { %v700_v31 = vmul.f32 1.5, %v559_v62  ;;  %v703_v45 = vmul.f32 1.5, %v561_v63  ;;  %v705_v46 = vadd.f32 -0.42140645, %v258_v32  ;;  %v195_v47 = vmul.f32 0.6931472, %v408_v43  ;;  %v414_v62 = vpop.eup %413 }
  0x37   :  { %421 = vlog2.f32 %v185_v30  ;;  %v707_v49 = vadd.f32 -0.42140645, %v259_v33  ;;  %v709_v50 = vadd.f32 -0.42140645, %v260_v34  ;;  %v197_v61 = vmul.f32 0.6931472, %v410_v11 }
  0x38   :  { %423 = vlog2.f32 %v186_v9  ;;  %v711_v59 = vadd.f32 -0.42140645, %v261_v35  ;;  %v713_v10 = vadd.f32 -0.42140645, %v262_v36  ;;  %v199_v58 = vmul.f32 0.6931472, %v412_v60 }
  0x39   :  { %425 = vlog2.f32 %v187_v29  ;;  %v715_v63 = vadd.f32 -0.42140645, %v263_v37  ;;  %v717_v32 = vadd.f32 -0.42140645, %v264_v39  ;;  %v416_v43 = vpop.eup %415  ;;  %v201_v30 = vmul.f32 0.6931472, %v414_v62 }
  0x3a   :  { %427 = vlog2.f32 %v188_v8  ;;  %v719_v33 = vadd.f32 -0.42140645, %v265_v15  ;;  %v721_v34 = vadd.f32 -0.42140645, %v266_v14  ;;  %v418_v11 = vpop.eup %417  ;;  %v203_v9 = vmul.f32 0.6931472, %v416_v43 }
  0x3b   :  { %429 = vlog2.f32 %v189_v28  ;;  %v724_v35 = vmul.f32 %v195_v47, %v612_v16  ;;  %v726_v36 = vadd.f32 -0.42140645, %v267_v40  ;;  %v420_v60 = vpop.eup %419  ;;  %v205_v29 = vmul.f32 0.6931472, %v418_v11 }
  0x3c   :  { %431 = vlog2.f32 %v190_v7  ;;  %v729_v37 = vmul.f32 %v197_v61, %v615_v17  ;;  %v732_v62 = vmul.f32 %v199_v58, %v618_v18  ;;  %v207_v39 = vmul.f32 0.6931472, %v420_v60 }
  0x3d   :  { %v422_v8 = vpop.eup %421  ;;  %433 = vlog2.f32 %v191_v27  ;;  %v735_v15 = vmul.f32 %v201_v30, %v621_v19  ;;  %v738_v16 = vmul.f32 %v203_v9, %v624_v20  ;;  %v742_v7 = vmul.f32 %v205_v29, %v627_v21 }
  0x3e   :  { %v424_v28 = vpop.eup %423  ;;  %v209_v14 = vmul.f32 0.6931472, %v422_v8  ;;  %435 = vlog2.f32 %v675_v6  ;;  %v744_v61 = vadd.f32 -0.42140645, %v268_v13  ;;  %v748_v18 = vmul.f32 %v207_v39, %v630_v22  ;;  %v876_v39 = vld [vmem:[#allocation19_spill] sm:$0xff] }
  0x3f   :  { %v426_v58 = vpop.eup %425  ;;  %v211_v17 = vmul.f32 0.6931472, %v424_v28  ;;  %437 = vlog2.f32 %v677_v26  ;;  %v242_v19 = vsub.f32 %v724_v35, %v564_v0  ;;  %v243_v6 = vsub.f32 %v729_v37, %v567_v1  ;;  %v873_v35 = vld [vmem:[#allocation28_spill] sm:$0xff] }
  0x40   :  { %v428_v20 = vpop.eup %427  ;;  %v213_v27 = vmul.f32 0.6931472, %v426_v58  ;;  %v233_v40 = vmul.f32 %v209_v14, %v633_v23  ;;  %v244_v21 = vsub.f32 %v732_v62, %v570_v2  ;;  %v245_v22 = vsub.f32 %v735_v15, %v573_v3  ;;  %v875_v62 = vld [vmem:[#allocation29_spill] sm:$0xff]  ;;  %v878_v14 = vld [vmem:[#allocation20_spill] sm:$0xff] }
  0x41   :  { %v430_v13 = vpop.eup %429  ;;  %v215_v47 = vmul.f32 0.6931472, %v428_v20  ;;  %v234_v26 = vmul.f32 %v211_v17, %v636_v24  ;;  %v246_v0 = vsub.f32 %v738_v16, %v576_v4  ;;  %v247_v1 = vsub.f32 %v742_v7, %v579_v5  ;;  %v874_v24 = vld [vmem:[#allocation18_spill] sm:$0xff] }
  0x42   :  { %v432_v43 = vpop.eup %431  ;;  %v217_v30 = vmul.f32 0.6931472, %v430_v13  ;;  %v235_v23 = vmul.f32 %v213_v27, %v639_v25  ;;  %v285_v11 = vadd.f32 -0.42140645, %v691_v41  ;;  %v248_v29 = vsub.f32 %v748_v18, %v874_v24  ;;  %v877_v41 = vld [vmem:[#allocation30_spill] sm:$0xff]  ;;  %v879_v18 = vld [vmem:[#allocation31_spill] sm:$0xff] }
  0x43   :  { %v434_v2 = vpop.eup %433  ;;  %v219_v9 = vmul.f32 0.6931472, %v432_v43  ;;  %v236_v60 = vmul.f32 %v215_v47, %v873_v35  ;;  %v286_v3 = vadd.f32 -0.42140645, %v694_v42  ;;  %v249_v25 = vsub.f32 %v233_v40, %v876_v39  ;;  %v880_v42 = vld [vmem:[#allocation21_spill] sm:$0xff]  ;;  %v881_v47 = vld [vmem:[#allocation32_spill] sm:$0xff] }
  0x44   :  { %v436_v37 = vpop.eup %435  ;;  %v221_v4 = vmul.f32 0.6931472, %v434_v2  ;;  %v237_v8 = vmul.f32 %v217_v30, %v875_v62  ;;  %v287_v15 = vadd.f32 -0.42140645, %v697_v12  ;;  %v250_v7 = vsub.f32 %v234_v26, %v878_v14  ;;  %v882_v40 = vld [vmem:[#allocation22_spill] sm:$0xff]  ;;  %v883_v12 = vld [vmem:[#allocation23_spill] sm:$0xff] }
  0x45   :  { %v438_v5 = vpop.eup %437  ;;  %v223_v16 = vmul.f32 0.6931472, %v436_v37  ;;  %v238_v28 = vmul.f32 %v219_v9, %v877_v41  ;;  %v288_v58 = vadd.f32 -0.42140645, %v700_v31  ;;  %v251_v27 = vsub.f32 %v235_v23, %v880_v42  ;;  %v884_v9 = vld [vmem:[#allocation33_spill] sm:$0xff]  ;;  %v885_v26 = vld [vmem:[#allocation24_spill] sm:$0xff] }
  0x46   :  { %v225_v17 = vmul.f32 0.6931472, %v438_v5  ;;  %v239_v20 = vmul.f32 %v221_v4, %v879_v18  ;;  %v289_v13 = vadd.f32 -0.42140645, %v703_v45  ;;  %v252_v30 = vsub.f32 %v236_v60, %v882_v40  ;;  %v886_v31 = vld [vmem:[#allocation25_spill] sm:$0xff]  ;;  %v887_v45 = vld [vmem:[#allocation26_spill] sm:$0xff] }
  0x47   :  { %v240_v43 = vmul.f32 %v223_v16, %v881_v47  ;;  %v253_v2 = vsub.f32 %v237_v8, %v883_v12  ;;  %v254_v24 = vsub.f32 %v238_v28, %v885_v26  ;;  %v888_v37 = vld [vmem:[#allocation27_spill] sm:$0xff]  ;;  %vm299_vm9 = vcmp.lt.f32.partialorder %v549_v57, 1.0  ;;  %v890_v4 = vld [vmem:[#allocation13_spill] sm:$0xff]  ;;  %v891_v5 = vld [vmem:[#allocation14_spill] sm:$0xff] }
  0x48   :  { %v241_v35 = vmul.f32 %v225_v17, %v884_v9  ;;  %v255_v23 = vsub.f32 %v239_v20, %v886_v31  ;;  %vm300_vm10 = vcmp.lt.f32.partialorder %v889_v48, 1.0  ;;  %vm301_vm11 = vcmp.lt.f32.partialorder %v890_v4, 1.0  ;;  %v892_v16 = vld [vmem:[#allocation15_spill] sm:$0xff] }
  0x49   :  { %v256_v60 = vsub.f32 %v240_v43, %v887_v45  ;;  %v306_v51 = vsel %vm290_vm0, %v242_v19, %v705_v46  ;;  %v307_v52 = vsel %vm291_vm1, %v243_v6, %v707_v49  ;;  %v308_v53 = vsel %vm292_vm2, %v244_v21, %v709_v50  ;;  %v894_v46 = vld [vmem:[#allocation17_spill] sm:$0xff] }
  0x4a   :  { %v257_v44 = vsub.f32 %v241_v35, %v888_v37  ;;  %v309_v54 = vsel %vm293_vm3, %v245_v22, %v711_v59  ;;  %v310_v55 = vsel %vm294_vm4, %v246_v0, %v713_v10  ;;  %v311_v62 = vsel %vm295_vm5, %v247_v1, %v715_v63 }
  0x4b   :  { %v312_v8 = vsel %vm296_vm6, %v248_v29, %v717_v32  ;;  %v313_v39 = vsel %vm297_vm7, %v249_v25, %v719_v33  ;;  %vm302_vm12 = vcmp.lt.f32.partialorder %v891_v5, 1.0  ;;  %vm303_vm13 = vcmp.lt.f32.partialorder %v892_v16, 1.0 }
  0x4c   :  { %vm304_vm14 = vcmp.lt.f32.partialorder %v893_v38, 1.0  ;;  %vm305_vm15 = vcmp.lt.f32.partialorder %v894_v46, 1.0  ;;  %v314_v59 = vsel %vm298_vm8, %v250_v7, %v721_v34  ;;  %v315_v63 = vsel %vm299_vm9, %v251_v27, %v726_v36 }
  0x4d   :  { %v316_v49 = vsel %vm300_vm10, %v252_v30, %v744_v61  ;;  %v317_v50 = vsel %vm301_vm11, %v253_v2, %v285_v11  ;;  %v322_v10 = vadd.f32 %v310_v55, %v306_v51  ;;  %v325_v32 = vadd.f32 %v311_v62, %v307_v52 }
  0x4e   :  { %v328_v33 = vadd.f32 %v312_v8, %v308_v53  ;;  %v331_v19 = vadd.f32 %v313_v39, %v309_v54  ;;  %v318_v6 = vsel %vm302_vm12, %v254_v24, %v286_v3  ;;  %v319_v21 = vsel %vm303_vm13, %v255_v23, %v287_v15 }
  0x4f   :  { %v320_v22 = vsel %vm304_vm14, %v256_v60, %v288_v58  ;;  %v323_v56 = vadd.f32 %v322_v10, %v314_v59  ;;  %v326_v34 = vadd.f32 %v325_v32, %v315_v63  ;;  %v321_v57 = vsel %vm305_vm15, %v257_v44, %v289_v13 }
  0x50   :  { %v329_v0 = vadd.f32 %v328_v33, %v316_v49  ;;  %v332_v1 = vadd.f32 %v331_v19, %v317_v50 }
  0x51   :  { %v324_v36 = vadd.f32 %v323_v56, %v318_v6  ;;  %v327_v29 = vadd.f32 %v326_v34, %v319_v21 }
  0x52   :  { %v330_v61 = vadd.f32 %v329_v0, %v320_v22  ;;  %v333_v25 = vadd.f32 %v332_v1, %v321_v57 }
  0x53   :  { %v365_v41 = vadd.f32 %v327_v29, %v324_v36 }
  0x55   :  { %v366_v11 = vadd.f32 %v365_v41, %v330_v61 }
  0x57   :  { %v367_v28 = vadd.f32 %v366_v11, %v333_v25 }
  0x59   :  { %368 = vadd.xlane.f32.xlu0 %v367_v28 }
  0xcc   :  { %v369_v14 = vpop.xlane.xlu0 %368 }
  0xcd   :  { %v370_v7 = vrot.slane %v369_v14, 4 }
  0xcf   :  { %v371_v3 = vadd.f32 %v370_v7, %v369_v14 }
  0xd1   :  { %v372_v15 = vrot.slane %v371_v3, 2 }
  0xd3   :  { %v373_v58 = vadd.f32 %v372_v15, %v371_v3 }
  0xd5   :  { %v374_v17 = vrot.slane %v373_v58, 1 }
  0xd7   :  { %v375_v18 = vadd.f32 %v374_v17, %v373_v58 }
  0xd9   :  { %400 = vpush %v375_v18 }
 0x10a   :  { %s401_s22 = spop %400 }
 0x10b   :  { %378 = sst [smem:[#allocation8]] %s401_s22 }
 0x10c   :  { %387 = dma.smem_to_hbm %s509_s23, 16, %s385_s21, [#allocation5]  }
 0x10d   :  { %503 = dma.done.wait [#allocation5], 16  }
 0x10e   :  { %504 = vsyncadd [#allocation5], 4294967280 }
 0x10f   :  { %392 = sfence }
 0x110   :  { %393 = vsyncpa [#allocation4], 1 }
 0x111   :  { %394 = vsyncpa [#allocation7], 1 }
 0x112   :  { %395 = vsyncpa [#allocation5], 1 }

</bundles_post_ra>
